<compile_context>
chip_gen: v5e
topology: v5e:2x2
jax: 0.10.0
libtpu: 0.0.40
codegen_flags: <defaults>
</compile_context>

<pallas_src>
import jax
import jax.numpy as jnp
from jax.experimental import pallas as pl
from jax.experimental.pallas import tpu as pltpu


def _make_rnn_kernel(L, T, Bp):
    """Kernel closed over static layer count L, sequence length T, padded batch Bp."""

    def kernel(*refs):
        # refs = [x_tb, (w_ihT, w_hhT, b2d) * L, fc_wT, fc_b2d, out]
        x_ref = refs[0]                        # (T*Bp, D_in0)  time-major, batch-padded
        layer_refs = refs[1:1 + 3 * L]
        fc_wT_ref = refs[1 + 3 * L]            # (H, O)
        fc_b_ref = refs[2 + 3 * L]             # (1, O)
        out_ref = refs[3 + 3 * L]              # (Bp, O)

        H = layer_refs[1].shape[0]             # w_hhT is (H, H)

        # Hoisted: each weight / fused bias read from VMEM exactly once per call.
        w_ihT = [layer_refs[3 * l + 0][...] for l in range(L)]   # (D_in_l, H)
        w_hhT = [layer_refs[3 * l + 1][...] for l in range(L)]   # (H, H)
        bias = [layer_refs[3 * l + 2][...] for l in range(L)]    # (1, H)

        # Layer-0 input projection for ALL timesteps: one (T*Bp, D) @ (D, H)
        # MXU matmul, entirely off the serialized recurrence chain.
        x_all = x_ref[...].astype(jnp.float32)
        proj0 = jnp.dot(x_all, w_ihT[0], preferred_element_type=jnp.float32) + bias[0]

        # Wavefront over the (layer, time) nest: at diagonal d, layer l runs
        # timestep t = d - l.  Dependence chain length = T + L - 1 (vs. L*T).
        h = [jnp.zeros((Bp, H), dtype=jnp.float32) for _ in range(L)]
        for d in range(T + L - 1):
            h_prev = list(h)                   # snapshot: values as of diagonal d-1
            for l in range(L):
                t = d - l
                if 0 <= t < T:
                    if l == 0:
                        # 8-row-aligned static slice of the batched projection.
                        pre = proj0[t * Bp:(t + 1) * Bp, :]
                    else:
                        # Per-step ih matmul; its operand h_prev[l-1] (layer l-1
                        # at step t) is ready at the start of this diagonal, so
                        # it can issue concurrently with the hh matmul below.
                        pre = jnp.dot(h_prev[l - 1], w_ihT[l],
                                      preferred_element_type=jnp.float32) + bias[l]
                    pre = pre + jnp.dot(h_prev[l], w_hhT[l],
                                        preferred_element_type=jnp.float32)
                    h[l] = jnp.maximum(pre, 0.0)          # relu nonlinearity

        # Final Linear on the last timestep of the top layer.
        out = (jnp.dot(h[L - 1], fc_wT_ref[...], preferred_element_type=jnp.float32)
               + fc_b_ref[...])
        out_ref[...] = out.astype(out_ref.dtype)

    return kernel


def prepare_rnn_params(w_ih_list, w_hh_list, b_ih_list, b_hh_list, fc_w, fc_b):
    """One-time parameter glue (load time, not per forward call): pre-transpose
    weights, fuse the two bias vectors, make biases 2-D."""
    params = []
    for l in range(len(w_ih_list)):
        params.append(jnp.asarray(w_ih_list[l], jnp.float32).T)                 # (D_in_l, H)
        params.append(jnp.asarray(w_hh_list[l], jnp.float32).T)                 # (H, H)
        params.append((jnp.asarray(b_ih_list[l], jnp.float32)
                       + jnp.asarray(b_hh_list[l], jnp.float32))[None, :])      # (1, H)
    params.append(jnp.asarray(fc_w, jnp.float32).T)                             # (H, O)
    params.append(jnp.asarray(fc_b, jnp.float32)[None, :])                      # (1, O)
    return tuple(params)


def rnn_model_forward(x, params):
    """x: (B, T, D) float32 (batch_first). params: output of prepare_rnn_params."""
    B, T, D = x.shape
    L = (len(params) - 2) // 3
    H = params[1].shape[0]
    O = params[-1].shape[-1]

    # Pad batch rows to the 8-sublane f32 tile so every per-step block in the
    # kernel is vreg-aligned.
    Bp = max(8, ((B + 7) // 8) * 8)

    # Time-major, batch-padded slab: timestep t is a contiguous, 8-aligned
    # block of Bp rows.
    x_tm = jnp.transpose(x, (1, 0, 2))                               # (T, B, D)
    x_tm = jnp.pad(x_tm, ((0, 0), (0, Bp - B), (0, 0)))              # (T, Bp, D)
    x_tb = x_tm.reshape(T * Bp, D)

    # Advisory cost estimate for the XLA scheduler.
    flops = 2 * (T * Bp) * D * H                   # layer-0 batched input projection
    for l in range(L):
        flops += 2 * T * Bp * H * H                # recurrent (hh) matmuls
        if l > 0:
            flops += 2 * T * Bp * H * H            # per-step ih matmuls, layers >= 1
    flops += 2 * Bp * H * O                        # final fc
    bytes_accessed = 4 * (T * Bp * D + sum(int(p.size) for p in params) + Bp * O)

    vmem_spec = pl.BlockSpec(memory_space=pltpu.MemorySpace.VMEM)
    kernel = _make_rnn_kernel(L, T, Bp)
    args = (x_tb,) + tuple(params)

    out_p = pl.pallas_call(
        kernel,
        out_shape=jax.ShapeDtypeStruct((Bp, O), jnp.float32),
        in_specs=[vmem_spec] * len(args),
        out_specs=vmem_spec,
        compiler_params=pltpu.CompilerParams(vmem_limit_bytes=32 * 1024 * 1024),
        cost_estimate=pl.CostEstimate(flops=flops, transcendentals=0,
                                      bytes_accessed=bytes_accessed),
    )(*args)
    return out_p[:B]


def rnn_model_reference(x, w_ih_list, w_hh_list, b_ih_list, b_hh_list, fc_w, fc_b):
    """Pure-JAX reference mirroring torch.nn.RNN(..., nonlinearity='relu') + Linear."""
    B, T, D = x.shape
    L = len(w_ih_list)
    H = w_hh_list[0].shape[0]
    h = [jnp.zeros((B, H), jnp.float32) for _ in range(L)]
    for t in range(T):
        inp = x[:, t, :]
        for l in range(L):
            pre = inp @ w_ih_list[l].T + b_ih_list[l] + h[l] @ w_hh_list[l].T + b_hh_list[l]
            h[l] = jnp.maximum(pre, 0.0)
            inp = h[l]
    return h[-1] @ fc_w.T + fc_b


if __name__ == "__main__":
    # Small shapes consistent with the module: batch=2, seq=8, input_dim=16,
    # hidden_dim=32, layer_dim=2, output_dim=4.
    B, T = 2, 8
    input_dim, hidden_dim, layer_dim, output_dim = 16, 32, 2, 4

    key = jax.random.PRNGKey(0)
    keys = jax.random.split(key, 4 * layer_dim + 3)
    bound = 1.0 / jnp.sqrt(hidden_dim)  # PyTorch default uniform init bound

    w_ih_list, w_hh_list, b_ih_list, b_hh_list = [], [], [], []
    ki = 0
    for l in range(layer_dim):
        d_in = input_dim if l == 0 else hidden_dim
        w_ih_list.append(jax.random.uniform(keys[ki], (hidden_dim, d_in),
                                            jnp.float32, -bound, bound)); ki += 1
        w_hh_list.append(jax.random.uniform(keys[ki], (hidden_dim, hidden_dim),
                                            jnp.float32, -bound, bound)); ki += 1
        b_ih_list.append(jax.random.uniform(keys[ki], (hidden_dim,),
                                            jnp.float32, -bound, bound)); ki += 1
        b_hh_list.append(jax.random.uniform(keys[ki], (hidden_dim,),
                                            jnp.float32, -bound, bound)); ki += 1

    fc_w = jax.random.uniform(keys[ki], (output_dim, hidden_dim),
                              jnp.float32, -bound, bound); ki += 1
    fc_b = jax.random.uniform(keys[ki], (output_dim,),
                              jnp.float32, -bound, bound); ki += 1
    x = jax.random.normal(keys[ki], (B, T, input_dim), jnp.float32)

    # Parameter glue is done ONCE, outside the per-call path.
    params = prepare_rnn_params(w_ih_list, w_hh_list, b_ih_list, b_hh_list, fc_w, fc_b)
    forward = jax.jit(rnn_model_forward)

    out = forward(x, params)
    out = jax.block_until_ready(out)

    ref = rnn_model_reference(x, w_ih_list, w_hh_list, b_ih_list, b_hh_list, fc_w, fc_b)
    assert out.shape == (B, output_dim)
    assert jnp.allclose(out, ref, atol=1e-5, rtol=1e-5), "mismatch vs pure-JAX reference"

    print("KERNEL_OK")
</pallas_src>

<mosaic_0001>
module attributes {stable_mosaic.version = 11 : i64} {
  func.func @kernel(%arg0: memref<64x16xf32, #tpu.memory_space<vmem>>, %arg1: memref<16x32xf32, #tpu.memory_space<vmem>>, %arg2: memref<32x32xf32, #tpu.memory_space<vmem>>, %arg3: memref<1x32xf32, #tpu.memory_space<vmem>>, %arg4: memref<32x32xf32, #tpu.memory_space<vmem>>, %arg5: memref<32x32xf32, #tpu.memory_space<vmem>>, %arg6: memref<1x32xf32, #tpu.memory_space<vmem>>, %arg7: memref<32x4xf32, #tpu.memory_space<vmem>>, %arg8: memref<1x4xf32, #tpu.memory_space<vmem>>, %arg9: memref<8x4xf32, #tpu.memory_space<vmem>>) attributes {dimension_semantics = [], scalar_prefetch = 0 : i64, scratch_operands = 0 : i64, tpu.core_type = #tpu.core_type<tc>} {
    %c0 = arith.constant 0 : index
    %c0_0 = arith.constant 0 : index
    %0 = vector.load %arg1[%c0, %c0_0] : memref<16x32xf32, #tpu.memory_space<vmem>>, vector<16x32xf32>
    %c0_1 = arith.constant 0 : index
    %c0_2 = arith.constant 0 : index
    %1 = vector.load %arg4[%c0_1, %c0_2] : memref<32x32xf32, #tpu.memory_space<vmem>>, vector<32x32xf32>
    %c0_3 = arith.constant 0 : index
    %c0_4 = arith.constant 0 : index
    %2 = vector.load %arg2[%c0_3, %c0_4] : memref<32x32xf32, #tpu.memory_space<vmem>>, vector<32x32xf32>
    %c0_5 = arith.constant 0 : index
    %c0_6 = arith.constant 0 : index
    %3 = vector.load %arg5[%c0_5, %c0_6] : memref<32x32xf32, #tpu.memory_space<vmem>>, vector<32x32xf32>
    %c0_7 = arith.constant 0 : index
    %c0_8 = arith.constant 0 : index
    %4 = vector.load %arg3[%c0_7, %c0_8] : memref<1x32xf32, #tpu.memory_space<vmem>>, vector<1x32xf32>
    %c0_9 = arith.constant 0 : index
    %c0_10 = arith.constant 0 : index
    %5 = vector.load %arg6[%c0_9, %c0_10] : memref<1x32xf32, #tpu.memory_space<vmem>>, vector<1x32xf32>
    %c0_11 = arith.constant 0 : index
    %c0_12 = arith.constant 0 : index
    %6 = vector.load %arg0[%c0_11, %c0_12] : memref<64x16xf32, #tpu.memory_space<vmem>>, vector<64x16xf32>
    %cst = arith.constant dense<0.000000e+00> : vector<64x32xf32>
    %7 = tpu.matmul %6, %0, %cst {dimension_numbers = #tpu.dot_dimension_numbers<[1], [0], [0], [1], [0, 0, 1, 1], [], []>} : vector<64x16xf32>, vector<16x32xf32>, vector<64x32xf32> -> vector<64x32xf32>
    %8 = vector.broadcast %4 : vector<1x32xf32> to vector<64x32xf32>
    %9 = arith.addf %7, %8 : vector<64x32xf32>
    %cst_13 = arith.constant 0.000000e+00 : f32
    %10 = vector.broadcast %cst_13 : f32 to vector<8x32xf32>
    %cst_14 = arith.constant 0.000000e+00 : f32
    %11 = vector.broadcast %cst_14 : f32 to vector<8x32xf32>
    %12 = vector.extract_strided_slice %9 {offsets = [0, 0], sizes = [8, 32], strides = [1, 1]} : vector<64x32xf32> to vector<8x32xf32>
    %cst_15 = arith.constant dense<0.000000e+00> : vector<8x32xf32>
    %13 = tpu.matmul %10, %2, %cst_15 {dimension_numbers = #tpu.dot_dimension_numbers<[1], [0], [0], [1], [0, 0, 1, 1], [], []>} : vector<8x32xf32>, vector<32x32xf32>, vector<8x32xf32> -> vector<8x32xf32>
    %14 = arith.addf %12, %13 : vector<8x32xf32>
    %cst_16 = arith.constant 0.000000e+00 : f32
    %15 = vector.broadcast %cst_16 : f32 to vector<8x32xf32>
    %16 = arith.maximumf %14, %15 : vector<8x32xf32>
    %17 = vector.extract_strided_slice %9 {offsets = [8, 0], sizes = [8, 32], strides = [1, 1]} : vector<64x32xf32> to vector<8x32xf32>
    %cst_17 = arith.constant dense<0.000000e+00> : vector<8x32xf32>
    %18 = tpu.matmul %16, %2, %cst_17 {dimension_numbers = #tpu.dot_dimension_numbers<[1], [0], [0], [1], [0, 0, 1, 1], [], []>} : vector<8x32xf32>, vector<32x32xf32>, vector<8x32xf32> -> vector<8x32xf32>
    %19 = arith.addf %17, %18 : vector<8x32xf32>
    %cst_18 = arith.constant 0.000000e+00 : f32
    %20 = vector.broadcast %cst_18 : f32 to vector<8x32xf32>
    %21 = arith.maximumf %19, %20 : vector<8x32xf32>
    %cst_19 = arith.constant dense<0.000000e+00> : vector<8x32xf32>
    %22 = tpu.matmul %16, %1, %cst_19 {dimension_numbers = #tpu.dot_dimension_numbers<[1], [0], [0], [1], [0, 0, 1, 1], [], []>} : vector<8x32xf32>, vector<32x32xf32>, vector<8x32xf32> -> vector<8x32xf32>
    %23 = vector.broadcast %5 : vector<1x32xf32> to vector<8x32xf32>
    %24 = arith.addf %22, %23 : vector<8x32xf32>
    %cst_20 = arith.constant dense<0.000000e+00> : vector<8x32xf32>
    %25 = tpu.matmul %11, %3, %cst_20 {dimension_numbers = #tpu.dot_dimension_numbers<[1], [0], [0], [1], [0, 0, 1, 1], [], []>} : vector<8x32xf32>, vector<32x32xf32>, vector<8x32xf32> -> vector<8x32xf32>
    %26 = arith.addf %24, %25 : vector<8x32xf32>
    %cst_21 = arith.constant 0.000000e+00 : f32
    %27 = vector.broadcast %cst_21 : f32 to vector<8x32xf32>
    %28 = arith.maximumf %26, %27 : vector<8x32xf32>
    %29 = vector.extract_strided_slice %9 {offsets = [16, 0], sizes = [8, 32], strides = [1, 1]} : vector<64x32xf32> to vector<8x32xf32>
    %cst_22 = arith.constant dense<0.000000e+00> : vector<8x32xf32>
    %30 = tpu.matmul %21, %2, %cst_22 {dimension_numbers = #tpu.dot_dimension_numbers<[1], [0], [0], [1], [0, 0, 1, 1], [], []>} : vector<8x32xf32>, vector<32x32xf32>, vector<8x32xf32> -> vector<8x32xf32>
    %31 = arith.addf %29, %30 : vector<8x32xf32>
    %cst_23 = arith.constant 0.000000e+00 : f32
    %32 = vector.broadcast %cst_23 : f32 to vector<8x32xf32>
    %33 = arith.maximumf %31, %32 : vector<8x32xf32>
    %cst_24 = arith.constant dense<0.000000e+00> : vector<8x32xf32>
    %34 = tpu.matmul %21, %1, %cst_24 {dimension_numbers = #tpu.dot_dimension_numbers<[1], [0], [0], [1], [0, 0, 1, 1], [], []>} : vector<8x32xf32>, vector<32x32xf32>, vector<8x32xf32> -> vector<8x32xf32>
    %35 = vector.broadcast %5 : vector<1x32xf32> to vector<8x32xf32>
    %36 = arith.addf %34, %35 : vector<8x32xf32>
    %cst_25 = arith.constant dense<0.000000e+00> : vector<8x32xf32>
    %37 = tpu.matmul %28, %3, %cst_25 {dimension_numbers = #tpu.dot_dimension_numbers<[1], [0], [0], [1], [0, 0, 1, 1], [], []>} : vector<8x32xf32>, vector<32x32xf32>, vector<8x32xf32> -> vector<8x32xf32>
    %38 = arith.addf %36, %37 : vector<8x32xf32>
    %cst_26 = arith.constant 0.000000e+00 : f32
    %39 = vector.broadcast %cst_26 : f32 to vector<8x32xf32>
    %40 = arith.maximumf %38, %39 : vector<8x32xf32>
    %41 = vector.extract_strided_slice %9 {offsets = [24, 0], sizes = [8, 32], strides = [1, 1]} : vector<64x32xf32> to vector<8x32xf32>
    %cst_27 = arith.constant dense<0.000000e+00> : vector<8x32xf32>
    %42 = tpu.matmul %33, %2, %cst_27 {dimension_numbers = #tpu.dot_dimension_numbers<[1], [0], [0], [1], [0, 0, 1, 1], [], []>} : vector<8x32xf32>, vector<32x32xf32>, vector<8x32xf32> -> vector<8x32xf32>
    %43 = arith.addf %41, %42 : vector<8x32xf32>
    %cst_28 = arith.constant 0.000000e+00 : f32
    %44 = vector.broadcast %cst_28 : f32 to vector<8x32xf32>
    %45 = arith.maximumf %43, %44 : vector<8x32xf32>
    %cst_29 = arith.constant dense<0.000000e+00> : vector<8x32xf32>
    %46 = tpu.matmul %33, %1, %cst_29 {dimension_numbers = #tpu.dot_dimension_numbers<[1], [0], [0], [1], [0, 0, 1, 1], [], []>} : vector<8x32xf32>, vector<32x32xf32>, vector<8x32xf32> -> vector<8x32xf32>
    %47 = vector.broadcast %5 : vector<1x32xf32> to vector<8x32xf32>
    %48 = arith.addf %46, %47 : vector<8x32xf32>
    %cst_30 = arith.constant dense<0.000000e+00> : vector<8x32xf32>
    %49 = tpu.matmul %40, %3, %cst_30 {dimension_numbers = #tpu.dot_dimension_numbers<[1], [0], [0], [1], [0, 0, 1, 1], [], []>} : vector<8x32xf32>, vector<32x32xf32>, vector<8x32xf32> -> vector<8x32xf32>
    %50 = arith.addf %48, %49 : vector<8x32xf32>
    %cst_31 = arith.constant 0.000000e+00 : f32
    %51 = vector.broadcast %cst_31 : f32 to vector<8x32xf32>
    %52 = arith.maximumf %50, %51 : vector<8x32xf32>
    %53 = vector.extract_strided_slice %9 {offsets = [32, 0], sizes = [8, 32], strides = [1, 1]} : vector<64x32xf32> to vector<8x32xf32>
    %cst_32 = arith.constant dense<0.000000e+00> : vector<8x32xf32>
    %54 = tpu.matmul %45, %2, %cst_32 {dimension_numbers = #tpu.dot_dimension_numbers<[1], [0], [0], [1], [0, 0, 1, 1], [], []>} : vector<8x32xf32>, vector<32x32xf32>, vector<8x32xf32> -> vector<8x32xf32>
    %55 = arith.addf %53, %54 : vector<8x32xf32>
    %cst_33 = arith.constant 0.000000e+00 : f32
    %56 = vector.broadcast %cst_33 : f32 to vector<8x32xf32>
    %57 = arith.maximumf %55, %56 : vector<8x32xf32>
    %cst_34 = arith.constant dense<0.000000e+00> : vector<8x32xf32>
    %58 = tpu.matmul %45, %1, %cst_34 {dimension_numbers = #tpu.dot_dimension_numbers<[1], [0], [0], [1], [0, 0, 1, 1], [], []>} : vector<8x32xf32>, vector<32x32xf32>, vector<8x32xf32> -> vector<8x32xf32>
    %59 = vector.broadcast %5 : vector<1x32xf32> to vector<8x32xf32>
    %60 = arith.addf %58, %59 : vector<8x32xf32>
    %cst_35 = arith.constant dense<0.000000e+00> : vector<8x32xf32>
    %61 = tpu.matmul %52, %3, %cst_35 {dimension_numbers = #tpu.dot_dimension_numbers<[1], [0], [0], [1], [0, 0, 1, 1], [], []>} : vector<8x32xf32>, vector<32x32xf32>, vector<8x32xf32> -> vector<8x32xf32>
    %62 = arith.addf %60, %61 : vector<8x32xf32>
    %cst_36 = arith.constant 0.000000e+00 : f32
    %63 = vector.broadcast %cst_36 : f32 to vector<8x32xf32>
    %64 = arith.maximumf %62, %63 : vector<8x32xf32>
    %65 = vector.extract_strided_slice %9 {offsets = [40, 0], sizes = [8, 32], strides = [1, 1]} : vector<64x32xf32> to vector<8x32xf32>
    %cst_37 = arith.constant dense<0.000000e+00> : vector<8x32xf32>
    %66 = tpu.matmul %57, %2, %cst_37 {dimension_numbers = #tpu.dot_dimension_numbers<[1], [0], [0], [1], [0, 0, 1, 1], [], []>} : vector<8x32xf32>, vector<32x32xf32>, vector<8x32xf32> -> vector<8x32xf32>
    %67 = arith.addf %65, %66 : vector<8x32xf32>
    %cst_38 = arith.constant 0.000000e+00 : f32
    %68 = vector.broadcast %cst_38 : f32 to vector<8x32xf32>
    %69 = arith.maximumf %67, %68 : vector<8x32xf32>
    %cst_39 = arith.constant dense<0.000000e+00> : vector<8x32xf32>
    %70 = tpu.matmul %57, %1, %cst_39 {dimension_numbers = #tpu.dot_dimension_numbers<[1], [0], [0], [1], [0, 0, 1, 1], [], []>} : vector<8x32xf32>, vector<32x32xf32>, vector<8x32xf32> -> vector<8x32xf32>
    %71 = vector.broadcast %5 : vector<1x32xf32> to vector<8x32xf32>
    %72 = arith.addf %70, %71 : vector<8x32xf32>
    %cst_40 = arith.constant dense<0.000000e+00> : vector<8x32xf32>
    %73 = tpu.matmul %64, %3, %cst_40 {dimension_numbers = #tpu.dot_dimension_numbers<[1], [0], [0], [1], [0, 0, 1, 1], [], []>} : vector<8x32xf32>, vector<32x32xf32>, vector<8x32xf32> -> vector<8x32xf32>
    %74 = arith.addf %72, %73 : vector<8x32xf32>
    %cst_41 = arith.constant 0.000000e+00 : f32
    %75 = vector.broadcast %cst_41 : f32 to vector<8x32xf32>
    %76 = arith.maximumf %74, %75 : vector<8x32xf32>
    %77 = vector.extract_strided_slice %9 {offsets = [48, 0], sizes = [8, 32], strides = [1, 1]} : vector<64x32xf32> to vector<8x32xf32>
    %cst_42 = arith.constant dense<0.000000e+00> : vector<8x32xf32>
    %78 = tpu.matmul %69, %2, %cst_42 {dimension_numbers = #tpu.dot_dimension_numbers<[1], [0], [0], [1], [0, 0, 1, 1], [], []>} : vector<8x32xf32>, vector<32x32xf32>, vector<8x32xf32> -> vector<8x32xf32>
    %79 = arith.addf %77, %78 : vector<8x32xf32>
    %cst_43 = arith.constant 0.000000e+00 : f32
    %80 = vector.broadcast %cst_43 : f32 to vector<8x32xf32>
    %81 = arith.maximumf %79, %80 : vector<8x32xf32>
    %cst_44 = arith.constant dense<0.000000e+00> : vector<8x32xf32>
    %82 = tpu.matmul %69, %1, %cst_44 {dimension_numbers = #tpu.dot_dimension_numbers<[1], [0], [0], [1], [0, 0, 1, 1], [], []>} : vector<8x32xf32>, vector<32x32xf32>, vector<8x32xf32> -> vector<8x32xf32>
    %83 = vector.broadcast %5 : vector<1x32xf32> to vector<8x32xf32>
    %84 = arith.addf %82, %83 : vector<8x32xf32>
    %cst_45 = arith.constant dense<0.000000e+00> : vector<8x32xf32>
    %85 = tpu.matmul %76, %3, %cst_45 {dimension_numbers = #tpu.dot_dimension_numbers<[1], [0], [0], [1], [0, 0, 1, 1], [], []>} : vector<8x32xf32>, vector<32x32xf32>, vector<8x32xf32> -> vector<8x32xf32>
    %86 = arith.addf %84, %85 : vector<8x32xf32>
    %cst_46 = arith.constant 0.000000e+00 : f32
    %87 = vector.broadcast %cst_46 : f32 to vector<8x32xf32>
    %88 = arith.maximumf %86, %87 : vector<8x32xf32>
    %89 = vector.extract_strided_slice %9 {offsets = [56, 0], sizes = [8, 32], strides = [1, 1]} : vector<64x32xf32> to vector<8x32xf32>
    %cst_47 = arith.constant dense<0.000000e+00> : vector<8x32xf32>
    %90 = tpu.matmul %81, %2, %cst_47 {dimension_numbers = #tpu.dot_dimension_numbers<[1], [0], [0], [1], [0, 0, 1, 1], [], []>} : vector<8x32xf32>, vector<32x32xf32>, vector<8x32xf32> -> vector<8x32xf32>
    %91 = arith.addf %89, %90 : vector<8x32xf32>
    %cst_48 = arith.constant 0.000000e+00 : f32
    %92 = vector.broadcast %cst_48 : f32 to vector<8x32xf32>
    %93 = arith.maximumf %91, %92 : vector<8x32xf32>
    %cst_49 = arith.constant dense<0.000000e+00> : vector<8x32xf32>
    %94 = tpu.matmul %81, %1, %cst_49 {dimension_numbers = #tpu.dot_dimension_numbers<[1], [0], [0], [1], [0, 0, 1, 1], [], []>} : vector<8x32xf32>, vector<32x32xf32>, vector<8x32xf32> -> vector<8x32xf32>
    %95 = vector.broadcast %5 : vector<1x32xf32> to vector<8x32xf32>
    %96 = arith.addf %94, %95 : vector<8x32xf32>
    %cst_50 = arith.constant dense<0.000000e+00> : vector<8x32xf32>
    %97 = tpu.matmul %88, %3, %cst_50 {dimension_numbers = #tpu.dot_dimension_numbers<[1], [0], [0], [1], [0, 0, 1, 1], [], []>} : vector<8x32xf32>, vector<32x32xf32>, vector<8x32xf32> -> vector<8x32xf32>
    %98 = arith.addf %96, %97 : vector<8x32xf32>
    %cst_51 = arith.constant 0.000000e+00 : f32
    %99 = vector.broadcast %cst_51 : f32 to vector<8x32xf32>
    %100 = arith.maximumf %98, %99 : vector<8x32xf32>
    %cst_52 = arith.constant dense<0.000000e+00> : vector<8x32xf32>
    %101 = tpu.matmul %93, %1, %cst_52 {dimension_numbers = #tpu.dot_dimension_numbers<[1], [0], [0], [1], [0, 0, 1, 1], [], []>} : vector<8x32xf32>, vector<32x32xf32>, vector<8x32xf32> -> vector<8x32xf32>
    %102 = vector.broadcast %5 : vector<1x32xf32> to vector<8x32xf32>
    %103 = arith.addf %101, %102 : vector<8x32xf32>
    %cst_53 = arith.constant dense<0.000000e+00> : vector<8x32xf32>
    %104 = tpu.matmul %100, %3, %cst_53 {dimension_numbers = #tpu.dot_dimension_numbers<[1], [0], [0], [1], [0, 0, 1, 1], [], []>} : vector<8x32xf32>, vector<32x32xf32>, vector<8x32xf32> -> vector<8x32xf32>
    %105 = arith.addf %103, %104 : vector<8x32xf32>
    %cst_54 = arith.constant 0.000000e+00 : f32
    %106 = vector.broadcast %cst_54 : f32 to vector<8x32xf32>
    %107 = arith.maximumf %105, %106 : vector<8x32xf32>
    %c0_55 = arith.constant 0 : index
    %c0_56 = arith.constant 0 : index
    %108 = vector.load %arg7[%c0_55, %c0_56] : memref<32x4xf32, #tpu.memory_space<vmem>>, vector<32x4xf32>
    %cst_57 = arith.constant dense<0.000000e+00> : vector<8x4xf32>
    %109 = tpu.matmul %107, %108, %cst_57 {dimension_numbers = #tpu.dot_dimension_numbers<[1], [0], [0], [1], [0, 0, 1, 1], [], []>} : vector<8x32xf32>, vector<32x4xf32>, vector<8x4xf32> -> vector<8x4xf32>
    %c0_58 = arith.constant 0 : index
    %c0_59 = arith.constant 0 : index
    %110 = vector.load %arg8[%c0_58, %c0_59] : memref<1x4xf32, #tpu.memory_space<vmem>>, vector<1x4xf32>
    %111 = vector.broadcast %110 : vector<1x4xf32> to vector<8x4xf32>
    %112 = arith.addf %109, %111 : vector<8x4xf32>
    %c0_60 = arith.constant 0 : index
    %c0_61 = arith.constant 0 : index
    %113 = vector.load %arg9[%c0_60, %c0_61] : memref<8x4xf32, #tpu.memory_space<vmem>>, vector<8x4xf32>
    tpu.vector_store %arg9[%c0_60, %c0_61], %112 {strides = array<i32>} : memref<8x4xf32, #tpu.memory_space<vmem>>, vector<8x4xf32>,
    return
  }
}

</mosaic_0001>

<bundles_post_ra>
// kernel: rnn_model_forward.1
= control target key start
LH: loop header
LB: loop body
LE: loop exit
PB: predicated region body
PF: predicated region fallthrough
CT: control target
= control target key end

     0   :  { %vm59_vm0 = vcmask 130048   ;;  %v761_v7 = vmov 0.0   ;;  %vm125_vm1 = vcmask 261120   ;;  %vm720_vm2 = vcmask 31744   ;;  %s1073_s2 = inlined_call_operand.vmem [shape: f32[32,32], index: 2, kind: input, shape index: {}]   ;;  %s1074_s1 = inlined_call_operand.vmem [shape: f32[16,32], index: 1, kind: input, shape index: {}]   ;;  %s1075_s0 = inlined_call_operand.vmem [shape: f32[64,16], index: 0, kind: input, shape index: {}]   ;;  %s1076_s3 = inlined_call_operand.vmem [shape: f32[1,32], index: 3, kind: input, shape index: {}]   ;;  %s1077_s4 = inlined_call_operand.vmem [shape: f32[32,32], index: 4, kind: input, shape index: {}]   ;;  %s1078_s5 = inlined_call_operand.vmem [shape: f32[32,32], index: 5, kind: input, shape index: {}]   ;;  %s1079_s6 = inlined_call_operand.vmem [shape: f32[1,32], index: 6, kind: input, shape index: {}]   ;;  %s1080_s7 = inlined_call_operand.vmem [shape: f32[32,4], index: 7, kind: input, shape index: {}]   ;;  %s1081_s8 = inlined_call_operand.vmem [shape: f32[1,4], index: 8, kind: input, shape index: {}]   ;;  %s1082_s9 = inlined_call_operand.vmem [shape: f32[8,4], index: 9, kind: output, shape index: {}]  }
   0x1   :  { %v815_v0 = vld [vmem:[%s1073_s2 + $0x18] sm:$0xff]  ;;  %v33_v1 = vld [vmem:[%s1074_s1 + $0x8] sm:$0xff]  ;;  %v823_v2 = vld [vmem:[%s1073_s2 + $0x10] sm:$0xff] }
   0x2   :  { %141 = vmatpush.msra.mxu1 %v815_v0  ;;  %98 = vmatpush.msra.mxu0 %v33_v1  ;;  %v32_v3 = vld [vmem:[%s1074_s1] sm:$0xff]  ;;  %v835_v5 = vld [vmem:[%s1073_s2 + $0x8] sm:$0xff]  ;;  %v857_v8 = vld [vmem:[%s1077_s4 + $0x18] sm:$0xff] }
   0x3   :  { %v48_v4 = vld [vmem:[%s1075_s0] sm:$0xff]  ;;  %166 = vmatpush.msra.mxu2 %v815_v0  ;;  %191 = vmatpush.msra.mxu3 %v857_v8  ;;  %v863_v9 = vld [vmem:[%s1077_s4 + $0x10] sm:$0xff]  ;;  %v869_v10 = vld [vmem:[%s1077_s4 + $0x8] sm:$0xff] }
   0x4   :  { %142 = vmatpush.msra.mxu1 %v823_v2  ;;  %99 = vmatpush.msra.mxu0 %v32_v3  ;;  %v843_v6 = vld [vmem:[%s1073_s2] sm:$0xff]  ;;  %v881_v12 = vld [vmem:[%s1078_s5 + $0x18] sm:$0xff]  ;;  %v886_v13 = vld [vmem:[%s1078_s5 + $0x10] sm:$0xff] }
   0x5   :  { %726 = vmatmul.msk.f32.vlgmr.msra.gmra.mxu0 %vm59_vm0, %v48_v4  ;;  %167 = vmatpush.msra.mxu2 %v823_v2  ;;  %v875_v11 = vld [vmem:[%s1077_s4] sm:$0xff]  ;;  %v49_v14 = vld [vmem:[%s1075_s0 + $0x8] sm:$0xff]  ;;  %v50_v23 = vld [vmem:[%s1075_s0 + $0x10] sm:$0xff] }
   0x6   :  { %143 = vmatpush.msra.mxu1 %v835_v5  ;;  %192 = vmatpush.msra.mxu3 %v863_v9  ;;  %v897_v15 = vld [vmem:[%s1078_s5 + $0x8] sm:$0xff]  ;;  %v904_v16 = vld [vmem:[%s1078_s5] sm:$0xff]  ;;  %v51_v35 = vld [vmem:[%s1075_s0 + $0x18] sm:$0xff] }
   0x7   :  { %168 = vmatpush.msra.mxu2 %v835_v5  ;;  %v919_v17 = vld [vmem:[%s1076_s3] ss:$0 sm:$0xff]  ;;  %v53_v57 = vld [vmem:[%s1075_s0 + $0x28] sm:$0xff] }
   0x8   :  { %144 = vmatpush.msra.mxu1 %v843_v6  ;;  %193 = vmatpush.msra.mxu3 %v869_v10  ;;  %v942_v26 = vld [vmem:[%s1079_s6] ss:$0 sm:$0xff] }
   0x9   :  { %145 = vmatmul.f32.vlgmr.msra.gmra.mxu1 %v761_v7  ;;  %169 = vmatpush.msra.mxu2 %v843_v6  ;;  %v52_v46 = vld [vmem:[%s1075_s0 + $0x20] sm:$0xff] }
   0xa   :  { %194 = vmatpush.msra.mxu3 %v875_v11  ;;  %211 = vmatpush.msrb.mxu1 %v881_v12 }
   0xb   :  { %236 = vmatpush.msrb.mxu2 %v815_v0 }
   0xc   :  { %258 = vmatpush.msrb.mxu3 %v857_v8  ;;  %212 = vmatpush.msrb.mxu1 %v886_v13 }
   0xd   :  { %237 = vmatpush.msrb.mxu2 %v823_v2  ;;  %727 = vmatmul.msk.f32.gmra.mxu0 %vm59_vm0, %v49_v14 }
   0xe   :  { %259 = vmatpush.msrb.mxu3 %v863_v9  ;;  %213 = vmatpush.msrb.mxu1 %v897_v15 }
   0xf   :  { %238 = vmatpush.msrb.mxu2 %v835_v5 }
  0x10   :  { %260 = vmatpush.msrb.mxu3 %v869_v10  ;;  %214 = vmatpush.msrb.mxu1 %v904_v16 }
  0x11   :  { %239 = vmatpush.msrb.mxu2 %v843_v6  ;;  %215 = vmatmul.f32.vlgmr.msrb.gmra.mxu1 %v761_v7 }
  0x12   :  { %261 = vmatpush.msrb.mxu3 %v875_v11  ;;  %281 = vmatpush.msra.mxu1 %v881_v12 }
  0x14   :  { %282 = vmatpush.msra.mxu1 %v886_v13 }
  0x15   :  { %728 = vmatmul.msk.f32.gmra.mxu0 %vm59_vm0, %v50_v23 }
  0x16   :  { %283 = vmatpush.msra.mxu1 %v897_v15 }
  0x18   :  { %284 = vmatpush.msra.mxu1 %v904_v16 }
  0x1a   :  { %351 = vmatpush.msrb.mxu1 %v881_v12 }
  0x1c   :  { %352 = vmatpush.msrb.mxu1 %v886_v13 }
  0x1d   :  { %729 = vmatmul.msk.f32.gmra.mxu0 %vm59_vm0, %v51_v35 }
  0x1e   :  { %353 = vmatpush.msrb.mxu1 %v897_v15 }
  0x20   :  { %354 = vmatpush.msrb.mxu1 %v904_v16 }
  0x25   :  { %730 = vmatmul.msk.f32.gmra.mxu0 %vm59_vm0, %v52_v46 }
  0x2d   :  { %731 = vmatmul.msk.f32.gmra.mxu0 %vm59_vm0, %v53_v57 }
  0x82   :  { %v101_v18 = vpop.f32.mrf.mxu0 }
  0x83   :  { %v102_v19 = vadd.f32 %v919_v17, %v101_v18 }
  0x86   :  { %v146_v20 = vpop.f32.mrf.mxu1 }
  0x87   :  { %v149_v21 = vadd.f32 %v146_v20, %v102_v19 }
  0x89   :  { %v150_v22 = vmax.f32 %v149_v21, 0.0 }
  0x8a   :  { %v104_v24 = vpop.f32.mrf.mxu0 }
  0x8b   :  { %734 = vmatmul.msk.f32.vlgmr.msra.gmra.mxu2 %vm125_vm1, %v150_v22  ;;  %735 = vmatmul.msk.f32.vlgmr.msra.gmra.mxu3 %vm125_vm1, %v150_v22  ;;  %v105_v25 = vadd.f32 %v919_v17, %v104_v24 }
  0x8c   :  { %306 = vmatpush.msra.mxu2 %v815_v0  ;;  %328 = vmatpush.msra.mxu3 %v857_v8 }
  0x8e   :  { %307 = vmatpush.msra.mxu2 %v823_v2  ;;  %329 = vmatpush.msra.mxu3 %v863_v9  ;;  %v216_v27 = vpop.f32.mrf.mxu1 }
  0x90   :  { %308 = vmatpush.msra.mxu2 %v835_v5  ;;  %330 = vmatpush.msra.mxu3 %v869_v10 }
  0x92   :  { %309 = vmatpush.msra.mxu2 %v843_v6  ;;  %331 = vmatpush.msra.mxu3 %v875_v11  ;;  %v107_v36 = vpop.f32.mrf.mxu0 }
  0x93   :  { %v108_v37 = vadd.f32 %v919_v17, %v107_v36 }
  0x9a   :  { %v110_v47 = vpop.f32.mrf.mxu0 }
  0x9b   :  { %v111_v48 = vadd.f32 %v919_v17, %v110_v47 }
  0xa2   :  { %v113_v58 = vpop.f32.mrf.mxu0 }
  0xa3   :  { %v114_v59 = vadd.f32 %v919_v17, %v113_v58 }
 0x10e   :  { %v171_v28 = vpop.f32.mrf.mxu2  ;;  %v196_v29 = vpop.f32.mrf.mxu3 }
 0x10f   :  { %v174_v30 = vadd.f32 %v171_v28, %v105_v25  ;;  %v197_v31 = vadd.f32 %v942_v26, %v196_v29  ;;  %v691_v29 = vld [vmem:[%s1080_s7 + $0x10] sm:$0xff] }
 0x111   :  { %v175_v32 = vmax.f32 %v174_v30, 0.0  ;;  %v219_v33 = vadd.f32 %v216_v27, %v197_v31  ;;  %v690_v30 = vld [vmem:[%s1080_s7 + $0x8] sm:$0xff]  ;;  %v689_v31 = vld [vmem:[%s1080_s7] sm:$0xff] }
 0x113   :  { %v220_v34 = vmax.f32 %v219_v33, 0.0  ;;  %736 = vmatmul.msk.f32.vlgmr.msrb.gmra.mxu2 %vm125_vm1, %v175_v32  ;;  %737 = vmatmul.msk.f32.vlgmr.msrb.gmra.mxu3 %vm125_vm1, %v175_v32 }
 0x114   :  { %376 = vmatpush.msrb.mxu2 %v815_v0  ;;  %398 = vmatpush.msrb.mxu3 %v857_v8 }
 0x115   :  { %738 = vmatmul.msk.f32.vlgmr.msra.gmra.mxu1 %vm125_vm1, %v220_v34 }
 0x116   :  { %377 = vmatpush.msrb.mxu2 %v823_v2  ;;  %399 = vmatpush.msrb.mxu3 %v863_v9 }
 0x117   :  { %421 = vmatpush.msra.mxu1 %v881_v12 }
 0x118   :  { %378 = vmatpush.msrb.mxu2 %v835_v5  ;;  %400 = vmatpush.msrb.mxu3 %v869_v10 }
 0x119   :  { %422 = vmatpush.msra.mxu1 %v886_v13 }
 0x11a   :  { %379 = vmatpush.msrb.mxu2 %v843_v6  ;;  %401 = vmatpush.msrb.mxu3 %v875_v11 }
 0x11b   :  { %423 = vmatpush.msra.mxu1 %v897_v15 }
 0x11d   :  { %424 = vmatpush.msra.mxu1 %v904_v16 }
 0x192   :  { %v286_v42 = vpop.f32.mrf.mxu1 }
 0x196   :  { %v241_v38 = vpop.f32.mrf.mxu2  ;;  %v263_v39 = vpop.f32.mrf.mxu3 }
 0x197   :  { %v244_v40 = vadd.f32 %v241_v38, %v108_v37  ;;  %v264_v41 = vadd.f32 %v942_v26, %v263_v39 }
 0x199   :  { %v245_v43 = vmax.f32 %v244_v40, 0.0  ;;  %v289_v44 = vadd.f32 %v286_v42, %v264_v41 }
 0x19b   :  { %v290_v45 = vmax.f32 %v289_v44, 0.0  ;;  %739 = vmatmul.msk.f32.vlgmr.msra.gmra.mxu2 %vm125_vm1, %v245_v43  ;;  %740 = vmatmul.msk.f32.vlgmr.msra.gmra.mxu3 %vm125_vm1, %v245_v43 }
 0x19c   :  { %446 = vmatpush.msra.mxu2 %v815_v0  ;;  %468 = vmatpush.msra.mxu3 %v857_v8 }
 0x19d   :  { %741 = vmatmul.msk.f32.vlgmr.msrb.gmra.mxu1 %vm125_vm1, %v290_v45 }
 0x19e   :  { %447 = vmatpush.msra.mxu2 %v823_v2  ;;  %469 = vmatpush.msra.mxu3 %v863_v9 }
 0x19f   :  { %491 = vmatpush.msrb.mxu1 %v881_v12 }
 0x1a0   :  { %448 = vmatpush.msra.mxu2 %v835_v5  ;;  %470 = vmatpush.msra.mxu3 %v869_v10 }
 0x1a1   :  { %492 = vmatpush.msrb.mxu1 %v886_v13 }
 0x1a2   :  { %449 = vmatpush.msra.mxu2 %v843_v6  ;;  %471 = vmatpush.msra.mxu3 %v875_v11 }
 0x1a3   :  { %493 = vmatpush.msrb.mxu1 %v897_v15 }
 0x1a5   :  { %494 = vmatpush.msrb.mxu1 %v904_v16 }
 0x21a   :  { %v356_v53 = vpop.f32.mrf.mxu1 }
 0x21e   :  { %v311_v49 = vpop.f32.mrf.mxu2  ;;  %v333_v50 = vpop.f32.mrf.mxu3 }
 0x21f   :  { %v314_v51 = vadd.f32 %v311_v49, %v111_v48  ;;  %v334_v52 = vadd.f32 %v942_v26, %v333_v50 }
 0x221   :  { %v315_v54 = vmax.f32 %v314_v51, 0.0  ;;  %v359_v55 = vadd.f32 %v356_v53, %v334_v52 }
 0x223   :  { %v360_v56 = vmax.f32 %v359_v55, 0.0  ;;  %742 = vmatmul.msk.f32.vlgmr.msrb.gmra.mxu2 %vm125_vm1, %v315_v54  ;;  %743 = vmatmul.msk.f32.vlgmr.msrb.gmra.mxu3 %vm125_vm1, %v315_v54 }
 0x224   :  { %516 = vmatpush.msrb.mxu2 %v815_v0  ;;  %538 = vmatpush.msrb.mxu3 %v857_v8 }
 0x225   :  { %744 = vmatmul.msk.f32.vlgmr.msra.gmra.mxu1 %vm125_vm1, %v360_v56 }
 0x226   :  { %517 = vmatpush.msrb.mxu2 %v823_v2  ;;  %539 = vmatpush.msrb.mxu3 %v863_v9 }
 0x227   :  { %561 = vmatpush.msra.mxu1 %v881_v12 }
 0x228   :  { %518 = vmatpush.msrb.mxu2 %v835_v5  ;;  %540 = vmatpush.msrb.mxu3 %v869_v10 }
 0x229   :  { %562 = vmatpush.msra.mxu1 %v886_v13 }
 0x22a   :  { %519 = vmatpush.msrb.mxu2 %v843_v6  ;;  %541 = vmatpush.msrb.mxu3 %v875_v11 }
 0x22b   :  { %563 = vmatpush.msra.mxu1 %v897_v15 }
 0x22d   :  { %564 = vmatpush.msra.mxu1 %v904_v16 }
 0x2a2   :  { %v426_v1 = vpop.f32.mrf.mxu1 }
 0x2a6   :  { %v381_v60 = vpop.f32.mrf.mxu2  ;;  %v403_v61 = vpop.f32.mrf.mxu3 }
 0x2a7   :  { %v384_v62 = vadd.f32 %v381_v60, %v114_v59  ;;  %v404_v63 = vadd.f32 %v942_v26, %v403_v61 }
 0x2a9   :  { %v385_v3 = vmax.f32 %v384_v62, 0.0  ;;  %v429_v4 = vadd.f32 %v426_v1, %v404_v63 }
 0x2ab   :  { %v430_v7 = vmax.f32 %v429_v4, 0.0  ;;  %745 = vmatmul.msk.f32.vlgmr.msra.gmra.mxu2 %vm125_vm1, %v385_v3  ;;  %746 = vmatmul.msk.f32.vlgmr.msra.gmra.mxu3 %vm125_vm1, %v385_v3 }
 0x2ac   :  { %586 = vmatpush.msra.mxu2 %v815_v0  ;;  %608 = vmatpush.msra.mxu3 %v857_v8  ;;  %v54_v0 = vld [vmem:[%s1075_s0 + $0x30] sm:$0xff] }
 0x2ad   :  { %747 = vmatmul.msk.f32.vlgmr.msrb.gmra.mxu1 %vm125_vm1, %v430_v7  ;;  %732 = vmatmul.msk.f32.gmra.mxu0 %vm59_vm0, %v54_v0 }
 0x2ae   :  { %587 = vmatpush.msra.mxu2 %v823_v2  ;;  %609 = vmatpush.msra.mxu3 %v863_v9  ;;  %v116_v2 = vpop.f32.mrf.mxu0 }
 0x2af   :  { %631 = vmatpush.msrb.mxu1 %v881_v12 }
 0x2b0   :  { %588 = vmatpush.msra.mxu2 %v835_v5  ;;  %610 = vmatpush.msra.mxu3 %v869_v10  ;;  %v117_v5 = vadd.f32 %v919_v17, %v116_v2 }
 0x2b1   :  { %632 = vmatpush.msrb.mxu1 %v886_v13 }
 0x2b2   :  { %589 = vmatpush.msra.mxu2 %v843_v6  ;;  %611 = vmatpush.msra.mxu3 %v875_v11 }
 0x2b3   :  { %633 = vmatpush.msrb.mxu1 %v897_v15 }
 0x2b5   :  { %634 = vmatpush.msrb.mxu1 %v904_v16 }
 0x32a   :  { %v496_v20 = vpop.f32.mrf.mxu1 }
 0x32e   :  { %v451_v14 = vpop.f32.mrf.mxu2  ;;  %v473_v18 = vpop.f32.mrf.mxu3 }
 0x32f   :  { %v454_v19 = vadd.f32 %v451_v14, %v117_v5  ;;  %v474_v6 = vadd.f32 %v942_v26, %v473_v18 }
 0x331   :  { %v455_v21 = vmax.f32 %v454_v19, 0.0  ;;  %v499_v22 = vadd.f32 %v496_v20, %v474_v6 }
 0x333   :  { %v500_v23 = vmax.f32 %v499_v22, 0.0  ;;  %748 = vmatmul.msk.f32.vlgmr.msrb.gmra.mxu2 %vm125_vm1, %v455_v21  ;;  %749 = vmatmul.msk.f32.vlgmr.msrb.gmra.mxu3 %vm125_vm1, %v455_v21 }
 0x334   :  { %656 = vmatpush.msrb.mxu2 %v857_v8  ;;  %679 = vmatpush.msrb.mxu3 %v881_v12  ;;  %v55_v8 = vld [vmem:[%s1075_s0 + $0x38] sm:$0xff]  ;;  %v119_v12 = vpop.f32.mrf.mxu0 }
 0x335   :  { %750 = vmatmul.msk.f32.vlgmr.msra.gmra.mxu1 %vm125_vm1, %v500_v23  ;;  %733 = vmatmul.msk.f32.gmra.mxu0 %vm59_vm0, %v55_v8  ;;  %v120_v24 = vadd.f32 %v919_v17, %v119_v12 }
 0x336   :  { %657 = vmatpush.msrb.mxu2 %v863_v9  ;;  %680 = vmatpush.msrb.mxu3 %v886_v13 }
 0x338   :  { %658 = vmatpush.msrb.mxu2 %v869_v10  ;;  %681 = vmatpush.msrb.mxu3 %v897_v15 }
 0x33a   :  { %659 = vmatpush.msrb.mxu2 %v875_v11  ;;  %682 = vmatpush.msrb.mxu3 %v904_v16  ;;  %v692_v16 = vld [vmem:[%s1080_s7 + $0x18] sm:$0xff] }
 0x33b   :  { %712 = vmatpush.msrb.mxu0 %v692_v16 }
 0x33d   :  { %713 = vmatpush.msrb.mxu0 %v691_v29 }
 0x33f   :  { %714 = vmatpush.msrb.mxu0 %v690_v30 }
 0x341   :  { %715 = vmatpush.msrb.mxu0 %v689_v31 }
 0x3b2   :  { %v566_v27 = vpop.f32.mrf.mxu1  ;;  %v122_v32 = vpop.f32.mrf.mxu0 }
 0x3b3   :  { %v123_v33 = vadd.f32 %v919_v17, %v122_v32  ;;  %v760_v17 = vld [vmem:[%s1081_s8] ss:$0 sm:$0xff] }
 0x3b6   :  { %v521_v9 = vpop.f32.mrf.mxu2  ;;  %v543_v25 = vpop.f32.mrf.mxu3 }
 0x3b7   :  { %v524_v13 = vadd.f32 %v521_v9, %v120_v24  ;;  %v544_v10 = vadd.f32 %v942_v26, %v543_v25 }
 0x3b9   :  { %v525_v15 = vmax.f32 %v524_v13, 0.0  ;;  %v569_v28 = vadd.f32 %v566_v27, %v544_v10 }
 0x3bb   :  { %v570_v11 = vmax.f32 %v569_v28, 0.0  ;;  %751 = vmatmul.msk.f32.vlgmr.msra.gmra.mxu2 %vm125_vm1, %v525_v15  ;;  %752 = vmatmul.msk.f32.vlgmr.msra.gmra.mxu3 %vm125_vm1, %v525_v15 }
 0x3bd   :  { %753 = vmatmul.msk.f32.vlgmr.msrb.gmra.mxu1 %vm125_vm1, %v570_v11 }
 0x43a   :  { %v636_v38 = vpop.f32.mrf.mxu1 }
 0x43e   :  { %v591_v34 = vpop.f32.mrf.mxu2  ;;  %v613_v35 = vpop.f32.mrf.mxu3 }
 0x43f   :  { %v594_v36 = vadd.f32 %v591_v34, %v123_v33  ;;  %v614_v37 = vadd.f32 %v942_v26, %v613_v35 }
 0x441   :  { %v595_v39 = vmax.f32 %v594_v36, 0.0  ;;  %v639_v40 = vadd.f32 %v636_v38, %v614_v37 }
 0x443   :  { %v640_v41 = vmax.f32 %v639_v40, 0.0  ;;  %754 = vmatmul.msk.f32.vlgmr.msrb.gmra.mxu2 %vm125_vm1, %v595_v39 }
 0x445   :  { %755 = vmatmul.msk.f32.vlgmr.msrb.gmra.mxu3 %vm125_vm1, %v640_v41 }
 0x4c6   :  { %v661_v42 = vpop.f32.mrf.mxu2 }
 0x4c7   :  { %v662_v43 = vadd.f32 %v942_v26, %v661_v42 }
 0x4c8   :  { %v684_v44 = vpop.f32.mrf.mxu3 }
 0x4c9   :  { %v687_v45 = vadd.f32 %v684_v44, %v662_v43 }
 0x4cb   :  { %v688_v46 = vmax.f32 %v687_v45, 0.0 }
 0x4cd   :  { %756 = vmatmul.msk.f32.vlgmr.msrb.gmra.mxu0 %vm125_vm1, %v688_v46 }
 0x54a   :  { %v717_v47 = vpop.f32.mrf.mxu0 }
 0x54b   :  { %v718_v48 = vadd.f32 %v760_v17, %v717_v47 }
 0x54d   :  { %721 = vst.msk [vmem:[%s1082_s9] sm:$0xff] %vm720_vm2, %v718_v48 }

</bundles_post_ra>
